<compile_context>
chip_gen: v7x
topology: tpu7x:2x2x1
jax: 0.10.0
libtpu: 0.0.40
codegen_flags: <defaults>
</compile_context>

<pallas_src>
import functools

import jax
import jax.numpy as jnp
from jax.experimental import pallas as pl
from jax.experimental.pallas import tpu as pltpu


# ----------------------------------------------------------------------------
# Kernel: refs = (c_col, W, bias, h_pl_tile, h_mi_tile, [sb1_tile], [sb2_tile], out_tile)
# ----------------------------------------------------------------------------
def _disc_kernel(has_sb1, has_sb2, c_ref, w_ref, b_ref, hpl_ref, hmi_ref, *rest):
    o_ref = rest[-1]
    opt = rest[:-1]

    # Shared bilinear factor, independent of the row tile:
    #   v[j] = sum_l W[j, l] * c[l]          -> (n_h, 1), canonical MXU layout.
    v = jnp.dot(w_ref[...], c_ref[...], preferred_element_type=jnp.float32)

    b = b_ref[0]                                       # scalar bias from SMEM
    sc1 = jnp.dot(hpl_ref[...], v, preferred_element_type=jnp.float32) + b
    sc2 = jnp.dot(hmi_ref[...], v, preferred_element_type=jnp.float32) + b

    i = 0
    if has_sb1:
        sc1 = sc1 + opt[i][...]
        i += 1
    if has_sb2:
        sc2 = sc2 + opt[i][...]
        i += 1

    # logits tile = cat([sc1, sc2], dim=1): single coalesced store.
    o_ref[...] = jnp.concatenate([sc1, sc2], axis=1)


def _pick_row_tile(n, max_rows=512):
    """Largest multiple-of-8 row tile <= max_rows that evenly divides n."""
    if n <= max_rows:
        return n
    t = max_rows
    while t >= 8:
        if n % t == 0:
            return t
        t -= 8
    return n


def discriminator_forward(c, h_pl, h_mi, w, bias, s_bias1=None, s_bias2=None):
    """Pallas equivalent of Discriminator.forward.

    `c` is the single shared context vector (the torch module broadcasts it
    via c.expand_as(h_pl)); it must have exactly n_h elements.
    """
    h_pl = jnp.asarray(h_pl, jnp.float32)
    h_mi = jnp.asarray(h_mi, jnp.float32)
    n, n_h = h_pl.shape

    c = jnp.asarray(c, jnp.float32)
    if c.size != n_h:
        raise ValueError("c must be a single shared context vector with n_h elements")
    c_col = c.reshape(n_h, 1)                          # never broadcast to (N, n_h)

    # torch Bilinear weight is (1, n_h, n_h); squeeze to (n_h, n_h).
    w = jnp.asarray(w, jnp.float32).reshape(n_h, n_h)
    bias = jnp.asarray(bias, jnp.float32).reshape(1)   # 1-D scalar for SMEM

    has_sb1 = s_bias1 is not None
    has_sb2 = s_bias2 is not None

    tn = _pick_row_tile(n)
    grid = (n // tn,)

    args = [c_col, w, bias, h_pl, h_mi]
    in_specs = [
        pl.BlockSpec((n_h, 1), lambda i: (0, 0)),                  # c column (resident)
        pl.BlockSpec((n_h, n_h), lambda i: (0, 0)),                # W (resident)
        pl.BlockSpec(memory_space=pltpu.MemorySpace.SMEM),         # scalar bias
        pl.BlockSpec((tn, n_h), lambda i: (i, 0)),                 # h_pl row tile
        pl.BlockSpec((tn, n_h), lambda i: (i, 0)),                 # h_mi row tile
    ]
    if has_sb1:
        args.append(jnp.broadcast_to(jnp.asarray(s_bias1, jnp.float32), (n, 1)))
        in_specs.append(pl.BlockSpec((tn, 1), lambda i: (i, 0)))
    if has_sb2:
        args.append(jnp.broadcast_to(jnp.asarray(s_bias2, jnp.float32), (n, 1)))
        in_specs.append(pl.BlockSpec((tn, 1), lambda i: (i, 0)))

    kernel = functools.partial(_disc_kernel, has_sb1, has_sb2)
    return pl.pallas_call(
        kernel,
        out_shape=jax.ShapeDtypeStruct((n, 2), jnp.float32),
        grid=grid,
        in_specs=in_specs,
        out_specs=pl.BlockSpec((tn, 2), lambda i: (i, 0)),
        compiler_params=pltpu.CompilerParams(
            dimension_semantics=("parallel",)),
    )(*args)


# ----------------------------------------------------------------------------
# Pure-JAX reference (matches torch.nn.Bilinear semantics).
# ----------------------------------------------------------------------------
def _reference(c, h_pl, h_mi, w, b):
    cx = jnp.broadcast_to(jnp.reshape(c, (1, -1)), h_pl.shape)
    sc1 = jnp.einsum("nj,jl,nl->n", h_pl, w, cx)[:, None] + b
    sc2 = jnp.einsum("nj,jl,nl->n", h_mi, w, cx)[:, None] + b
    return jnp.concatenate([sc1, sc2], axis=1)


# ----------------------------------------------------------------------------
# main
# ----------------------------------------------------------------------------
if __name__ == "__main__":
    N = 16      # nodes / batch rows
    NH = 32     # n_h

    key = jax.random.PRNGKey(0)
    kc, kp, km, kw = jax.random.split(key, 4)

    # xavier_uniform-style init for the bilinear weight (torch layout (1, n_h, n_h)).
    bound = (6.0 / (NH * NH + NH)) ** 0.5
    w = jax.random.uniform(kw, (1, NH, NH), jnp.float32, -bound, bound)
    b = jnp.full((1,), 0.1, jnp.float32)   # nonzero to exercise the bias path

    c = jax.random.normal(kc, (NH,), jnp.float32)       # shared context vector
    h_pl = jax.random.normal(kp, (N, NH), jnp.float32)
    h_mi = jax.random.normal(km, (N, NH), jnp.float32)

    fwd = jax.jit(discriminator_forward)
    logits = jax.block_until_ready(fwd(c, h_pl, h_mi, w, b))

    ref = _reference(c, h_pl, h_mi, w.reshape(NH, NH), b[0])
    assert logits.shape == (N, 2)
    assert bool(jnp.all(jnp.isfinite(logits)))
    assert bool(jnp.allclose(logits, ref, atol=1e-4, rtol=1e-4))

    # Optional s_bias1 / s_bias2 path (static flags -> separate specialization).
    sb1 = jax.random.normal(jax.random.PRNGKey(1), (N, 1), jnp.float32)
    sb2 = jax.random.normal(jax.random.PRNGKey(2), (N, 1), jnp.float32)
    logits_sb = jax.block_until_ready(
        jax.jit(discriminator_forward)(c, h_pl, h_mi, w, b, sb1, sb2))
    ref_sb = ref + jnp.concatenate([sb1, sb2], axis=1)
    assert bool(jnp.allclose(logits_sb, ref_sb, atol=1e-4, rtol=1e-4))

    print("KERNEL_OK")
</pallas_src>

<mosaic_0001>
module attributes {stable_mosaic.version = 11 : i64} {
  func.func @_disc_kernel(%arg0: i32, %arg1: memref<32x1xf32, #tpu.memory_space<vmem>>, %arg2: memref<32x32xf32, #tpu.memory_space<vmem>>, %arg3: memref<1xf32, #tpu.memory_space<smem>>, %arg4: memref<16x32xf32, #tpu.memory_space<vmem>>, %arg5: memref<16x32xf32, #tpu.memory_space<vmem>>, %arg6: memref<16x2xf32, #tpu.memory_space<vmem>>) attributes {dimension_semantics = [#tpu.dimension_semantics<parallel>], iteration_bounds = array<i64: 1>, scalar_prefetch = 0 : i64, scratch_operands = 0 : i64, tpu.core_type = #tpu.core_type<tc>, window_params = [{pipeline_mode = #tpu.pipeline_mode<synchronous>, transform_indices = @transform_0, window_bounds = array<i64: 32, 1>}, {pipeline_mode = #tpu.pipeline_mode<synchronous>, transform_indices = @transform_1, window_bounds = array<i64: 32, 32>}, {transform_indices = @transform_2, window_bounds = array<i64: 1>}, {transform_indices = @transform_3, window_bounds = array<i64: 16, 32>}, {transform_indices = @transform_4, window_bounds = array<i64: 16, 32>}, {transform_indices = @transform_5, window_bounds = array<i64: 16, 2>}]} {
    %c0 = arith.constant 0 : index
    %c0_0 = arith.constant 0 : index
    %0 = vector.load %arg2[%c0, %c0_0] : memref<32x32xf32, #tpu.memory_space<vmem>>, vector<32x32xf32>
    %c0_1 = arith.constant 0 : index
    %c0_2 = arith.constant 0 : index
    %1 = vector.load %arg1[%c0_1, %c0_2] : memref<32x1xf32, #tpu.memory_space<vmem>>, vector<32x1xf32>
    %cst = arith.constant dense<0.000000e+00> : vector<32x1xf32>
    %2 = tpu.matmul %0, %1, %cst {dimension_numbers = #tpu.dot_dimension_numbers<[1], [0], [0], [1], [0, 0, 1, 1], [], []>} : vector<32x32xf32>, vector<32x1xf32>, vector<32x1xf32> -> vector<32x1xf32>
    %c0_3 = arith.constant 0 : index
    %3 = memref.load %arg3[%c0_3] : memref<1xf32, #tpu.memory_space<smem>>
    %c0_4 = arith.constant 0 : index
    %c0_5 = arith.constant 0 : index
    %4 = vector.load %arg4[%c0_4, %c0_5] : memref<16x32xf32, #tpu.memory_space<vmem>>, vector<16x32xf32>
    %cst_6 = arith.constant dense<0.000000e+00> : vector<16x1xf32>
    %5 = tpu.matmul %4, %2, %cst_6 {dimension_numbers = #tpu.dot_dimension_numbers<[1], [0], [0], [1], [0, 0, 1, 1], [], []>} : vector<16x32xf32>, vector<32x1xf32>, vector<16x1xf32> -> vector<16x1xf32>
    %6 = vector.broadcast %3 : f32 to vector<16x1xf32>
    %7 = arith.addf %5, %6 : vector<16x1xf32>
    %c0_7 = arith.constant 0 : index
    %c0_8 = arith.constant 0 : index
    %8 = vector.load %arg5[%c0_7, %c0_8] : memref<16x32xf32, #tpu.memory_space<vmem>>, vector<16x32xf32>
    %cst_9 = arith.constant dense<0.000000e+00> : vector<16x1xf32>
    %9 = tpu.matmul %8, %2, %cst_9 {dimension_numbers = #tpu.dot_dimension_numbers<[1], [0], [0], [1], [0, 0, 1, 1], [], []>} : vector<16x32xf32>, vector<32x1xf32>, vector<16x1xf32> -> vector<16x1xf32>
    %10 = vector.broadcast %3 : f32 to vector<16x1xf32>
    %11 = arith.addf %9, %10 : vector<16x1xf32>
    %12 = tpu.concatenate %7, %11 in 1 : vector<16x1xf32>, vector<16x1xf32> -> vector<16x2xf32>
    %c0_10 = arith.constant 0 : index
    %c0_11 = arith.constant 0 : index
    %13 = vector.load %arg6[%c0_10, %c0_11] : memref<16x2xf32, #tpu.memory_space<vmem>>, vector<16x2xf32>
    tpu.vector_store %arg6[%c0_10, %c0_11], %12 {strides = array<i32>} : memref<16x2xf32, #tpu.memory_space<vmem>>, vector<16x2xf32>,
    return
  }
  func.func @transform_0(%arg0: i32) -> (i32, i32) {
    %c0_i32 = arith.constant 0 : i32
    %c0_i32_0 = arith.constant 0 : i32
    %c0_i32_1 = arith.constant 0 : i32
    return %c0_i32, %c0_i32_0 : i32, i32
  }
  func.func @transform_1(%arg0: i32) -> (i32, i32) {
    %c0_i32 = arith.constant 0 : i32
    %c0_i32_0 = arith.constant 0 : i32
    %c0_i32_1 = arith.constant 0 : i32
    return %c0_i32, %c0_i32_0 : i32, i32
  }
  func.func @transform_2(%arg0: i32) -> i32 {
    %c0_i32 = arith.constant 0 : i32
    %c0_i32_0 = arith.constant 0 : i32
    return %c0_i32 : i32
  }
  func.func @transform_3(%arg0: i32) -> (i32, i32) {
    %c0_i32 = arith.constant 0 : i32
    %c0_i32_0 = arith.constant 0 : i32
    return %arg0, %c0_i32 : i32, i32
  }
  func.func @transform_4(%arg0: i32) -> (i32, i32) {
    %c0_i32 = arith.constant 0 : i32
    %c0_i32_0 = arith.constant 0 : i32
    return %arg0, %c0_i32 : i32, i32
  }
  func.func @transform_5(%arg0: i32) -> (i32, i32) {
    %c0_i32 = arith.constant 0 : i32
    %c0_i32_0 = arith.constant 0 : i32
    return %arg0, %c0_i32 : i32, i32
  }
}

</mosaic_0001>

<bundles_post_ra>
// kernel: discriminator_forward.1
= control target key start
LH: loop header
LB: loop body
LE: loop exit
PB: predicated region body
PF: predicated region fallthrough
CT: control target
= control target key end

     0   :  { %11 = vsyncpa [#allocation4], 0  ;;  %s444_s18 = smov [#allocation3]   ;;  %s537_s0 = inlined_call_operand.vmem [shape: f32[32,1], index: 0, kind: input, shape index: {}]   ;;  %s538_s1 = inlined_call_operand.vmem [shape: f32[32,32], index: 1, kind: input, shape index: {}]   ;;  %s539_s2 = inlined_call_operand.<no memory space> [shape: f32[1], index: 2, kind: input, shape index: {}]   ;;  %s540_s3 = inlined_call_operand.vmem [shape: f32[16,32], index: 3, kind: input, shape index: {}]   ;;  %s541_s4 = inlined_call_operand.hbm [shape: f32[16,32], index: 4, kind: input, shape index: {}]   ;;  %s542_s5 = inlined_call_operand.vmem [shape: f32[16,2], index: 5, kind: output, shape index: {}]  }
   0x1   :  { %s25_s19 = sshll.u32 %s444_s18, 4  ;;  %s420_s22 = scalar_lea.hbm %s541_s4, 256  ;;  %s26_s19 = int_to_ptr.vmem [resolvable:$true] %s25_s19 }
   0x2   :  { %p421_p0 = scmp.ne.s32.totalorder %s541_s4, %s420_s22  ;;  %p424_p1 = scmp.lt.u32.totalorder %s420_s22, %s541_s4 }
   0x4   :  { %p426_p2 = pnand %p424_p1, %p421_p0 }
   0x6   :  { %429 = shalt.err (!%p426_p2)
}
   0x7   :  { %s430_s27 = scalar_lea.vmem %s26_s19, 256  ;;  %p435_p4 = scmp.lt.s32.totalorder %s26_s19, %s26_s19 }
   0x8   :  { %p431_p3 = scmp.ne.s32.totalorder %s26_s19, %s430_s27  ;;  %p436_p5 = scmp.lt.s32.totalorder %s430_s27, %s430_s27 }
   0xa   :  { %p437_p6 = por %p436_p5, %p435_p4 }
   0xc   :  { %p438_p7 = pnand %p437_p6, %p431_p3 }
   0xe   :  { %441 = shalt.err (!%p438_p7)
}
   0xf   :  { %s445_s28 = smov 128   ;;  %s446_s29 = smov 8  }
  0x10   :  { %31 = dma.hbm_to_vmem [thread:$0]  %s541_s4, 256, %s26_s19, [#allocation4], %s445_s28, %s445_s28, %s446_s29  }
  0x11   :  { %442 = dma.done.wait [#allocation4], 256  }
  0x12   :  { %443 = vsyncadd [#allocation4], 4294967040  ;;  %vm43_vm0 = vcmask 261120   ;;  %v39_v0 = vld [vmem:[%s537_s0] sm:$0xff]  ;;  %v40_v1 = vld [vmem:[%s537_s0 + $0x8] sm:$0xff]  ;;  %v144_v20 = vstv %s539_s2  ;;  %s447_s26 = smov 1  }
  0x13   :  { %v41_v2 = vld [vmem:[%s537_s0 + $0x10] sm:$0xff]  ;;  %v392_v3 = vpack.c.bf16 %v40_v1, %v39_v0  ;;  %v42_v4 = vld [vmem:[%s537_s0 + $0x18] sm:$0xff]  ;;  %v35_v5 = vld [vmem:[%s538_s1] sm:$0xff]  ;;  %vm317_vm1 = vcmask 7168   ;;  %vm320_vm2 = vcmask 15360  }
  0x14   :  { %v396_v6 = vpack.c.bf16 %v42_v4, %v41_v2  ;;  %364 = vmatprep.mubr.msk.f32.mxu0 %vm43_vm0, %v35_v5  ;;  %v36_v7 = vld [vmem:[%s538_s1 + $0x8] sm:$0xff]  ;;  %v37_v8 = vld [vmem:[%s538_s1 + $0x10] sm:$0xff]  ;;  %v38_v9 = vld [vmem:[%s538_s1 + $0x18] sm:$0xff] }
  0x15   :  { %393 = vmatprep.subr.bf16.mxu0 %v392_v3  ;;  %v226_v10 = vld [vmem:[#allocation3] sm:$0xff]  ;;  %v227_v18 = vld [vmem:[#allocation3 + $0x8] sm:$0xff] }
  0x16   :  { %395 = vmatpush3.bf16.msra.mxu0 %v392_v3  ;;  %v142_v11 = vld [vmem:[%s540_s3] sm:$0xff]  ;;  %v143_v19 = vld [vmem:[%s540_s3 + $0x8] sm:$0xff] }
  0x17   :  { %397 = vmatprep.subr.bf16.mxu0 %v396_v6  ;;  %378 = vmatprep.mubr.msk.f32.mxu1 %vm43_vm0, %v142_v11 }
  0x1a   :  { %399 = vmatpush3.bf16.msra.mxu0 %v396_v6 }
  0x1d   :  { %365 = vmatmul.mubr.msk.f32.vlgmr.msra.gmra.mrb[0].mxu0 %vm43_vm0, %v36_v7 }
  0x1e   :  { %367 = vmatprep.mubr.msk.f32.mxu0 %vm43_vm0, %v37_v8 }
  0x21   :  { %368 = vmatmul.mubr.msk.f32.gmra.mrb[2].mxu0 %vm43_vm0, %v38_v9 }
  0x22   :  { %389 = vmatprep.mubr.msk.f32.mxu0 %vm43_vm0, %v226_v10 }
  0xf0   :  { %v366_v12 = vpop.f32.mrb[0].mxu0 }
  0xf1   :  { %v122_v13 = vpop.f32.mrb[1].mxu0 }
  0xf2   :  { %v400_v14 = vpack.c.bf16 %v366_v12, %v122_v13 }
  0xf4   :  { %v369_v15 = vpop.f32.mrb[2].mxu0  ;;  %401 = vmatprep.subr.bf16.mxu1 %v400_v14  ;;  %409 = vmatprep.subr.bf16.mxu0 %v400_v14 }
  0xf5   :  { %v132_v16 = vpop.f32.mrb[3].mxu0  ;;  %403 = vmatpush3.bf16.msra.mxu1 %v400_v14  ;;  %411 = vmatpush3.bf16.msra.mxu0 %v400_v14 }
  0xf6   :  { %v404_v17 = vpack.c.bf16 %v369_v15, %v132_v16 }
  0xf8   :  { %405 = vmatprep.subr.bf16.mxu1 %v404_v17  ;;  %413 = vmatprep.subr.bf16.mxu0 %v404_v17 }
  0xf9   :  { %407 = vmatpush3.bf16.msra.mxu1 %v404_v17  ;;  %415 = vmatpush3.bf16.msra.mxu0 %v404_v17 }
  0xfc   :  { %390 = vmatmul.mubr.msk.f32.vlgmr.msra.gmra.mrb[4].mxu0 %vm43_vm0, %v227_v18  ;;  %379 = vmatmul.mubr.msk.f32.vlgmr.msra.gmra.mrb[0].mxu1 %vm43_vm0, %v143_v19 }
 0x1cf   :  { %v391_v21 = vpop.f32.mrb[4].mxu0  ;;  %v380_v22 = vpop.f32.mrb[0].mxu1 }
 0x1d0   :  { %v300_v23 = vpop.f32.mrb[5].mxu0  ;;  %v223_v24 = vadd.f32 %v380_v22, %v144_v20  ;;  %v217_v25 = vpop.f32.mrb[1].mxu1  ;;  %v306_v28 = vadd.f32 %v391_v21, %v144_v20 }
 0x1d1   :  { %v301_v26 = vadd.f32 %v300_v23, %v144_v20  ;;  %v218_v27 = vadd.f32 %v217_v25, %v144_v20 }
 0x1d3   :  { %311 = vrot.lane.b32.xlu0 %v301_v26, %s447_s26 }
 0x1d7   :  { %313 = vrot.lane.b32.xlu0 %v306_v28, %s447_s26 }
 0x245   :  { %v312_v29 = vpop.permute.xlu0 %311 }
 0x246   :  { %v318_v30 = vsel %vm317_vm1, %v218_v27, %v312_v29 }
 0x247   :  { %321 = vst.msk [vmem:[%s542_s5] sm:$0xff] %vm320_vm2, %v318_v30 }
 0x249   :  { %v314_v31 = vpop.permute.xlu0 %313 }
 0x24a   :  { %v319_v32 = vsel %vm317_vm1, %v223_v24, %v314_v31 }
 0x24b   :  { %322 = vst.msk [vmem:[%s542_s5 + $0x8] sm:$0xff] %vm320_vm2, %v319_v32 }
 0x24c   :  { %327 = vsyncpa [#allocation4], 1 }

</bundles_post_ra>
